<compile_context>
chip_gen: v6e
topology: v6e:2x2x1
jax: 0.10.0
libtpu: 0.0.40
codegen_flags: <defaults>
</compile_context>

<pallas_src>
import jax
import jax.numpy as jnp
import numpy as np
from jax.experimental import pallas as pl
from jax.experimental.pallas import tpu as pltpu


def _round_up(x, m):
    return ((x + m - 1) // m) * m


def _linear_kernel(x_ref, w_ref, b_ref, o_ref):
    # x_ref: (TM, D)   w_ref: (D, Fp)   b_ref: (1, Fp)   o_ref: (TM, Fp)
    # Single MXU matmul with f32 accumulation; f32 bias add; direct lane-dense
    # store (Fp is a multiple of 128 -> unmasked vst).
    y = jnp.dot(x_ref[...], w_ref[...], preferred_element_type=jnp.float32)
    o_ref[...] = (y + b_ref[...]).astype(o_ref.dtype)


def prepare_output_process_params(weight, bias, *, compute_dtype=jnp.bfloat16):
    """One-time parameter prep (hoist/cache this across calls):
      * transpose the torch nn.Linear weight (F, D) -> (D, F) so the kernel runs
        a plain row-major MXU matmul (no Mosaic-inserted transpose),
      * pad F up to a multiple of 128 (lane-dense output stores, full MXU N),
      * cast the weight to the compute dtype (bf16 by default; MXU accumulates f32).
    Returns (w_df_padded, bias_padded_f32_row, F_original).
    """
    F, D = weight.shape
    Fp = _round_up(max(F, 128), 128)
    w_df = jnp.transpose(weight, (1, 0))
    b = bias
    if Fp != F:
        w_df = jnp.pad(w_df, ((0, 0), (0, Fp - F)))
        b = jnp.pad(b, ((0, Fp - F),))
    w_df = w_df.astype(compute_dtype if compute_dtype is not None else weight.dtype)
    b2 = b.reshape(1, Fp).astype(jnp.float32)
    return w_df, b2, F


def _choose_tm(M, block_m):
    # Rows per grid step: biggest multiple-of-8 tile <= block_m, but keep at
    # least 2 grid steps so the "parallel" axis feeds both TensorCores on v7x.
    tm = min(block_m, _round_up(M, 8))
    if M > 8 and pl.cdiv(M, tm) < 2:
        tm = _round_up(pl.cdiv(M, 2), 8)
    return max(8, tm)


def output_process_pallas(output, weight, bias, output_feats, nfeats, *,
                          block_m=1024, compute_dtype=jnp.bfloat16,
                          prepared=None):
    """Forward of OutputProcess.

    output: (nframes, bs, latent_dim)
    weight: (output_feats*nfeats, latent_dim)   -- torch nn.Linear layout
    bias:   (output_feats*nfeats,)
    returns (bs, output_feats, nfeats, nframes)

    compute_dtype: activation/weight dtype fed to the MXU (default bf16;
      accumulation and the bias epilogue stay f32).  None -> pure f32 I/O.
    prepared: optional result of prepare_output_process_params() to avoid the
      per-call weight transpose / padding.
    block_m: rows per grid step.  1024 is a good default on v5e/v6e (128 MiB
      VMEM); keep <=1024 on v7x (64 MiB per TC) -- the wrapper only sets
      vmem_limit_bytes when the estimated working set exceeds the scoped default.
    """
    T, B, D = output.shape
    M = T * B

    if prepared is None:
        prepared = prepare_output_process_params(weight, bias,
                                                 compute_dtype=compute_dtype)
    w_df, b2, F = prepared
    Fp = w_df.shape[1]
    if F != output_feats * nfeats:
        raise ValueError(
            f"weight rows ({F}) must equal output_feats*nfeats "
            f"({output_feats}*{nfeats}={output_feats * nfeats})")

    # Free row-major flatten: (T, B, D) -> (M, D). No transpose, no HBM pass.
    x2 = output.reshape(M, D)
    if compute_dtype is not None:
        x2 = x2.astype(compute_dtype)

    if M < 64:
        # Small-problem fallback: a 1-step grid has nothing to pipeline and the
        # fixed pallas_call overhead exceeds XLA's fused matmul at this scale.
        y = jnp.dot(x2, w_df, preferred_element_type=jnp.float32) + b2
        y = y.astype(output.dtype)
    else:
        tm = _choose_tm(M, block_m)
        grid_m = pl.cdiv(M, tm)   # no jnp.pad: Pallas masks the partial tail tile

        # VMEM estimate (double-buffered activation/output tiles + resident
        # weight/bias).  Only raise the scoped limit when actually needed; on
        # v7x prefer shrinking block_m instead of pushing past ~28 MiB.
        vmem_est = 2 * (tm * D * x2.dtype.itemsize
                        + tm * Fp * output.dtype.itemsize) \
                   + 2 * (D * Fp * w_df.dtype.itemsize + Fp * 4)
        cparams = dict(dimension_semantics=("parallel",))
        if vmem_est > 28 * 2**20:
            cparams["vmem_limit_bytes"] = int(min(2 * vmem_est, 120 * 2**20))

        y = pl.pallas_call(
            _linear_kernel,
            out_shape=jax.ShapeDtypeStruct((M, Fp), output.dtype),
            grid_spec=pltpu.PrefetchScalarGridSpec(
                num_scalar_prefetch=0,
                grid=(grid_m,),
                in_specs=[
                    pl.BlockSpec((tm, D), lambda i: (i, 0)),   # activation tile
                    pl.BlockSpec((D, Fp), lambda i: (0, 0)),   # weight, grid-invariant
                    pl.BlockSpec((1, Fp), lambda i: (0, 0)),   # bias,   grid-invariant
                ],
                out_specs=pl.BlockSpec((tm, Fp), lambda i: (i, 0)),
            ),
            compiler_params=pltpu.CompilerParams(**cparams),
        )(x2, w_df, b2)

    if Fp != F:
        y = y[:, :F]           # drop the lane padding (fuses into the permute)

    # Module semantics: reshape + permute to (bs, output_feats, nfeats, nframes).
    y = y.reshape(T, B, output_feats, nfeats)
    return jnp.transpose(y, (1, 2, 3, 0))


def _reference_output_process(x, w, b, output_feats, nfeats):
    """Pure numpy reference of the PyTorch OutputProcess forward."""
    x = np.asarray(x, dtype=np.float32)
    w = np.asarray(w, dtype=np.float32)
    b = np.asarray(b, dtype=np.float32)
    T, B, D = x.shape
    y = x.reshape(-1, D) @ w.T + b
    y = y.reshape(T, B, output_feats, nfeats)
    return np.transpose(y, (1, 2, 3, 0))


if __name__ == "__main__":
    key = jax.random.PRNGKey(0)
    k1, k2, k3, k4 = jax.random.split(key, 4)

    # --- Case 1: default bf16-I/O path, F = 150 padded to 256 lanes, 2-step grid ---
    nframes, bs, latent_dim = 64, 4, 128
    output_feats, nfeats = 25, 6                      # F = 150
    x = jax.random.normal(k1, (nframes, bs, latent_dim), dtype=jnp.float32)
    bound = 1.0 / np.sqrt(latent_dim)
    weight = jax.random.uniform(k2, (output_feats * nfeats, latent_dim),
                                dtype=jnp.float32, minval=-bound, maxval=bound)
    bias = jax.random.uniform(k3, (output_feats * nfeats,), dtype=jnp.float32,
                              minval=-bound, maxval=bound)

    # Hoist the one-time weight transpose / F-padding out of the per-call path.
    params_bf16 = prepare_output_process_params(weight, bias)
    out_bf16 = output_process_pallas(x, weight, bias, output_feats, nfeats,
                                     prepared=params_bf16)
    out_bf16 = jax.block_until_ready(out_bf16)
    ref = _reference_output_process(x, weight, bias, output_feats, nfeats)
    assert out_bf16.shape == (bs, output_feats, nfeats, nframes), out_bf16.shape
    # bf16 inputs -> f32 accumulation: only input-quantization error.
    np.testing.assert_allclose(np.asarray(out_bf16), ref, rtol=3e-2, atol=3e-2)

    # --- Case 2: pure-f32 path, M = 72 not divisible by the 40-row tile
    # (exercises the pad-free pl.cdiv grid / masked tail tile), tight tolerance ---
    nframes2, bs2, latent_dim2 = 36, 2, 32
    output_feats2, nfeats2 = 12, 1                    # F = 12 -> padded to 128
    x2 = jax.random.normal(k4, (nframes2, bs2, latent_dim2), dtype=jnp.float32)
    bound2 = 1.0 / np.sqrt(latent_dim2)
    kw, kb = jax.random.split(k2)
    weight2 = jax.random.uniform(kw, (output_feats2 * nfeats2, latent_dim2),
                                 dtype=jnp.float32, minval=-bound2, maxval=bound2)
    bias2 = jax.random.uniform(kb, (output_feats2 * nfeats2,), dtype=jnp.float32,
                               minval=-bound2, maxval=bound2)
    out_f32 = output_process_pallas(x2, weight2, bias2, output_feats2, nfeats2,
                                    compute_dtype=None)
    out_f32 = jax.block_until_ready(out_f32)
    ref2 = _reference_output_process(x2, weight2, bias2, output_feats2, nfeats2)
    assert out_f32.shape == (bs2, output_feats2, nfeats2, nframes2), out_f32.shape
    np.testing.assert_allclose(np.asarray(out_f32), ref2, rtol=1e-5, atol=1e-4)

    print("KERNEL_OK")
</pallas_src>

<mosaic_0001>
module attributes {stable_mosaic.version = 11 : i64} {
  func.func @_linear_kernel(%arg0: i32, %arg1: memref<128x128xbf16, #tpu.memory_space<vmem>>, %arg2: memref<128x256xbf16, #tpu.memory_space<vmem>>, %arg3: memref<1x256xf32, #tpu.memory_space<vmem>>, %arg4: memref<128x256xf32, #tpu.memory_space<vmem>>) attributes {dimension_semantics = [#tpu.dimension_semantics<parallel>], iteration_bounds = array<i64: 2>, scalar_prefetch = 0 : i64, scratch_operands = 0 : i64, tpu.core_type = #tpu.core_type<tc>, window_params = [{transform_indices = @transform_0, window_bounds = array<i64: 128, 128>}, {pipeline_mode = #tpu.pipeline_mode<synchronous>, transform_indices = @transform_1, window_bounds = array<i64: 128, 256>}, {pipeline_mode = #tpu.pipeline_mode<synchronous>, transform_indices = @transform_2, window_bounds = array<i64: 1, 256>}, {transform_indices = @transform_3, window_bounds = array<i64: 128, 256>}]} {
    %c0 = arith.constant 0 : index
    %c0_0 = arith.constant 0 : index
    %0 = vector.load %arg1[%c0, %c0_0] : memref<128x128xbf16, #tpu.memory_space<vmem>>, vector<128x128xbf16>
    %c0_1 = arith.constant 0 : index
    %c0_2 = arith.constant 0 : index
    %1 = vector.load %arg2[%c0_1, %c0_2] : memref<128x256xbf16, #tpu.memory_space<vmem>>, vector<128x256xbf16>
    %cst = arith.constant dense<0.000000e+00> : vector<128x256xf32>
    %2 = tpu.matmul %0, %1, %cst {dimension_numbers = #tpu.dot_dimension_numbers<[1], [0], [0], [1], [0, 0, 1, 1], [], []>} : vector<128x128xbf16>, vector<128x256xbf16>, vector<128x256xf32> -> vector<128x256xf32>
    %c0_3 = arith.constant 0 : index
    %c0_4 = arith.constant 0 : index
    %3 = vector.load %arg3[%c0_3, %c0_4] : memref<1x256xf32, #tpu.memory_space<vmem>>, vector<1x256xf32>
    %4 = vector.broadcast %3 : vector<1x256xf32> to vector<128x256xf32>
    %5 = arith.addf %2, %4 : vector<128x256xf32>
    %c0_5 = arith.constant 0 : index
    %c0_6 = arith.constant 0 : index
    %6 = vector.load %arg4[%c0_5, %c0_6] : memref<128x256xf32, #tpu.memory_space<vmem>>, vector<128x256xf32>
    tpu.vector_store %arg4[%c0_5, %c0_6], %5 {strides = array<i32>} : memref<128x256xf32, #tpu.memory_space<vmem>>, vector<128x256xf32>,
    return
  }
  func.func @transform_0(%arg0: i32) -> (i32, i32) {
    %c0_i32 = arith.constant 0 : i32
    %c0_i32_0 = arith.constant 0 : i32
    return %arg0, %c0_i32 : i32, i32
  }
  func.func @transform_1(%arg0: i32) -> (i32, i32) {
    %c0_i32 = arith.constant 0 : i32
    %c0_i32_0 = arith.constant 0 : i32
    %c0_i32_1 = arith.constant 0 : i32
    return %c0_i32, %c0_i32_0 : i32, i32
  }
  func.func @transform_2(%arg0: i32) -> (i32, i32) {
    %c0_i32 = arith.constant 0 : i32
    %c0_i32_0 = arith.constant 0 : i32
    %c0_i32_1 = arith.constant 0 : i32
    return %c0_i32, %c0_i32_0 : i32, i32
  }
  func.func @transform_3(%arg0: i32) -> (i32, i32) {
    %c0_i32 = arith.constant 0 : i32
    %c0_i32_0 = arith.constant 0 : i32
    return %arg0, %c0_i32 : i32, i32
  }
}

</mosaic_0001>

<bundles_post_ra>
// kernel: tpu_custom_call.1
= control target key start
LH: loop header
LB: loop body
LE: loop exit
PB: predicated region body
PF: predicated region fallthrough
CT: control target
= control target key end

     0   :  { %8 = vsyncpa [#allocation3], 0  ;;  %s1202_s0 = inlined_call_operand.hbm [shape: bf16[256,128], index: 0, kind: input, shape index: {}]   ;;  %s1203_s1 = inlined_call_operand.hbm [shape: bf16[128,256], index: 1, kind: input, shape index: {}]   ;;  %s1204_s2 = inlined_call_operand.vmem [shape: f32[1,256], index: 2, kind: input, shape index: {}]   ;;  %s1205_s3 = inlined_call_operand.hbm [shape: f32[256,256], index: 3, kind: output, shape index: {}]  }
   0x1   :  { %10 = vsyncpa [#allocation3 + $0x1], 0 }
   0x2   :  { %11 = vsyncpa [#allocation6], 0 }
   0x3   :  { %12 = vsyncpa [#allocation4], 0 }
   0x4   :  { %14 = vsyncpa [#allocation4 + $0x1], 0  ;;  %s932_s12 = smov 0   ;;  %s934_s13 = smov 0  }
   0x5   :  { %s936_s14 = smov 0   ;;  %s938_s15 = smov 0  }
   0x6 LB: > { %s953_s16 = sadd.s32 4294967295, %s900_s15   ;;  %s622_s17 = sadd.s32 4294967294, %s900_s15   ;;  %s900_s15 = sphi %s938_s15, %s1227_s15   ;;  %s896_s14 = sphi %s936_s14, %s1226_s14   ;;  %s892_s13 = sphi %s934_s13, %s1225_s13   ;;  %s888_s12 = sphi %s932_s12, %s1224_s12  }
   0x7   : > { %p40_p0 = scmp.ne.s32.totalorder %s892_s13, %s888_s12  ;;  %p1206_p1 = scmp.eq.s32.totalorder %s953_s16, 0 }
   0x8   : > { %p112_p3 = scmp.eq.s32.totalorder %s622_s17, 1  ;;  %p623_p5 = scmp.ge.s32.totalorder %s900_s15, 1 }
   0x9   : > { %p962_p4 = por %p1206_p1, %p40_p0  ;;  %p119_p7 = scmp.lt.s32.totalorder %s900_s15, 3 }
   0xa   : > { %p967_p6 = por %p112_p3, %p40_p0  ;;  %s902_s21 = smov [#allocation5]  }
   0xb   : > { %s1210_s18 = scalar_select %p962_p4, 1, 0 }
   0xc   : > { %s1211_s19 = scalar_select %p967_p6, 1, 0 }
   0xd   : > { %p972_p8 = pnand %p623_p5, %p119_p7  ;;  %s131_s22 = sshll.u32 %s902_s21, 4  ;;  %s132_s22 = int_to_ptr.vmem [resolvable:$true] %s131_s22 }
   0xe   : > { %s986_s24 = sadd.s32 1, %s900_s15   ;;  %s27_s25 = sadd.s32 1, %s896_s14 }
   0xf   : > { %s1212_s20 = scalar_select %p972_p8, 1, 0 }
  0x10   : > { %p690_p9 = pneg %p972_p8  ;;  %s24_s26 = ssub.s32 %s900_s15, %s986_s24 }
  0x11   : > { %s789_s27 = scalar_lea.vmem %s132_s22, 2048  ;;  %p797_p5 = scmp.lt.s32.totalorder %s132_s22, %s132_s22 }
  0x12   : > { %p981_p11 = pnand %p690_p9, %p1206_p1  ;;  %p790_p13 = scmp.ne.s32.totalorder %s132_s22, %s789_s27 }
  0x13   : > { %p798_p7 = scmp.lt.s32.totalorder %s789_s27, %s789_s27 }
  0x14   : > { %p780_p12 = pneg %p981_p11 }
  0x15   : > { %p799_p10 = por %p798_p7, %p797_p5 }
  0x16   : > { %p792_p0 = pnand %p790_p13, %p780_p12 }
  0x18   : > { %p793_p3 = pneg %p792_p0 }
  0x1a   : > { %p800_p2 = pnand %p799_p10, %p793_p3 }
  0x1c   : > { %803 = shalt.err (!%p800_p2)
}
  0x1d   : > { %s903_s28 = smov 128   ;;  %s904_s29 = smov 8  }
  0x1e   : > { %693 = dma.hbm_to_vmem [thread:$0]  (!%p981_p11), %s1203_s1, 2048, %s132_s22, [#allocation6], %s903_s28, %s903_s28, %s904_s29  }
  0x1f   : > { %p25_p9 = scmp.eq.s32.totalorder %s24_s26, 0  ;;  %p34_p12 = scmp.ne.s32.totalorder %s896_s14, %s892_s13 }
  0x20   : > { %p35_p10 = scmp.eq.s32.totalorder %s900_s15, 0  ;;  %p703_p2 = scmp.lt.s32.totalorder %s900_s15, 2 }
  0x21   : > { %s1003_s5 = scalar_select %p25_p9, %s896_s14, %s27_s25  }
  0x22   : > { %p36_p13 = por %p35_p10, %p34_p12  ;;  %p1214_p0 = scmp.eq.s32.totalorder %s953_s16, 1 }
  0x23   : > { %s148_s7 = sand.u32 1, %s896_s14   ;;  %s663_s8 = sshll.u32 %s900_s15, 10 }
  0x24   : > { %p1007_p3 = por %p1214_p0, %p34_p12  ;;  %s626_s9 = sshll.u32 %s148_s7, 6 }
  0x25   : > { %s1016_s17 = scalar_lea.hbm %s1202_s0, %s663_s8  ;;  %s152_s21 = scalar_lea.vmem [#allocation2], %s626_s9 }
  0x26   : > { %s1215_s6 = scalar_select %p1007_p3, 1, 0 }
  0x27   : > { %s159_s22 = sshll.u32 %s152_s21, 4  ;;  %p1018_p11 = pnand %p703_p2, %p36_p13  ;;  %s1022_s22 = int_to_ptr.vmem [resolvable:$true] %s159_s22 }
  0x28   : > { %s1024_s25 = scalar_lea.sflag [#allocation3], %s148_s7  ;;  %s804_s26 = scalar_lea.hbm %s1016_s17, 1024 }
  0x29   : > { %p805_p5 = scmp.ne.s32.totalorder %s1016_s17, %s804_s26  ;;  %p806_p7 = pneg %p1018_p11 }
  0x2a   : > { %s809_s29 = scalar_lea.hbm %s1202_s0, 2048  ;;  %p810_p10 = scmp.lt.s32.totalorder %s1016_s17, %s1202_s0 }
  0x2b   : > { %p807_p9 = pnand %p806_p7, %p805_p5  ;;  %p811_p2 = scmp.lt.s32.totalorder %s809_s29, %s804_s26 }
  0x2d   : > { %p808_p12 = pneg %p807_p9  ;;  %p812_p13 = por %p811_p2, %p810_p10 }
  0x2f   : > { %p813_p0 = pnand %p812_p13, %p808_p12 }
  0x31   : > { %816 = shalt.err (!%p813_p0)
}
  0x32   : > { %s817_s7 = scalar_lea.vmem %s1022_s22, 1024  ;;  %s905_s8 = smov [#allocation2]  }
  0x33   : > { %p818_p1 = scmp.ne.s32.totalorder %s1022_s22, %s817_s7  ;;  %s822_s9 = sshll.u32 %s905_s8, 4  ;;  %s823_s9 = int_to_ptr.vmem [resolvable:$false] %s822_s9 }
  0x34   : > { %s824_s10 = scalar_lea.vmem %s823_s9, 2048  ;;  %p825_p9 = scmp.lt.s32.totalorder %s1022_s22, %s823_s9 }
  0x35   : > { %p820_p6 = pnand %p818_p1, %p806_p7  ;;  %p826_p3 = scmp.lt.s32.totalorder %s824_s10, %s817_s7 }
  0x37   : > { %p821_p5 = pneg %p820_p6  ;;  %p827_p4 = por %p826_p3, %p825_p9 }
  0x39   : > { %p828_p8 = pnand %p827_p4, %p821_p5 }
  0x3b   : > { %831 = shalt.err (!%p828_p8)
}
  0x3c   : > { %s906_s11 = smov 64   ;;  %s907_s21 = smov 4  }
  0x3d   : > { %697 = dma.hbm_to_vmem [thread:$0]  (!%p1018_p11), %s1016_s17, 1024, %s1022_s22, %s1024_s25, %s906_s11, %s906_s11, %s907_s21  }
  0x3e   : > { %p1217_p1 = scmp.ne.s32.totalorder %s1212_s20, 0 }
  0x3f   : > { %s1048_s26 = sand.u32 (!%p1217_p1), 1, %s892_s13   ;;  %p1218_p4 = scmp.ne.s32.totalorder (!%p1217_p1), %s1210_s18, 0 }
  0x40   : > { %171 = sbr.rel (%p1217_p1) target bundleno = 346 (0x15a), region = 32  ;;  %s630_s27 = sshll.u32 (!%p1217_p1), %s1048_s26, 6 }
  0x41   : > { %s174_s28 = scalar_lea.sflag (!%p1217_p1), [#allocation3], %s1048_s26  ;;  %s1052_s29 = scalar_lea.vmem (!%p1217_p1), [#allocation2], %s630_s27 }
  0x45   : > { %875 = dma.done.wait (%p1218_p4), %s174_s28, 1024  }
  0x46   : > { %877 = vsyncadd (%p1218_p4), %s174_s28, 4294966272  ;;  %p1219_p6 = scmp.eq.s32.totalorder %s953_s16, 0 }
  0x48   : > { %879 = dma.done.wait (%p1219_p6), [#allocation6], 2048   ;;  %p1220_p8 = pmov %p1219_p6 }
  0x49   : > { %v908_v0 = vmov 0   ;;  %v746_v1 = vld [vmem:[#allocation5 + $0x74] ss:$8 sps:$4 sm:$0xff]   ;;  %v748_v2 = vld [vmem:[#allocation5 + $0x70] ss:$8 sps:$4 sm:$0xff]   ;;  %v770_v17 = vld [vmem:[%s1052_s29] sm:$0xff]   ;;  %v241_v25 = vlaneseq }
  0x4a   : > { %881 = vsyncadd (%p1220_p8), [#allocation6], 4294965248  ;;  %411 = vmatprep.mubr.bf16.mxu0 %v908_v0  ;;  %451 = vmatprep.mubr.bf16.mxu1 %v908_v0  ;;  %v749_v3 = vld [vmem:[#allocation5 + $0x64] ss:$8 sps:$4 sm:$0xff]   ;;  %v751_v4 = vld [vmem:[#allocation5 + $0x60] ss:$8 sps:$4 sm:$0xff]  }
  0x4b   : > { %379 = vmatprep.subr.bf16.mxu0 %v746_v1  ;;  %666 = vmatprep.subr.bf16.mxu1 %v746_v1  ;;  %v752_v5 = vld [vmem:[#allocation5 + $0x54] ss:$8 sps:$4 sm:$0xff]   ;;  %v754_v6 = vld [vmem:[#allocation5 + $0x50] ss:$8 sps:$4 sm:$0xff]   ;;  %v755_v7 = vld [vmem:[#allocation5 + $0x44] ss:$8 sps:$4 sm:$0xff]  }
  0x4c   : > { %380 = vmatpush1.bf16.msra.mxu0 %v748_v2  ;;  %674 = vmatpush1.bf16.msra.mxu1 %v748_v2  ;;  %v757_v8 = vld [vmem:[#allocation5 + $0x40] ss:$8 sps:$4 sm:$0xff]   ;;  %v758_v9 = vld [vmem:[#allocation5 + $0x34] ss:$8 sps:$4 sm:$0xff]   ;;  %v760_v10 = vld [vmem:[#allocation5 + $0x30] ss:$8 sps:$4 sm:$0xff]  }
  0x4d   : > { %381 = vmatprep.subr.bf16.mxu0 %v749_v3  ;;  %667 = vmatprep.subr.bf16.mxu1 %v749_v3  ;;  %v761_v11 = vld [vmem:[#allocation5 + $0x24] ss:$8 sps:$4 sm:$0xff]   ;;  %v763_v12 = vld [vmem:[#allocation5 + $0x20] ss:$8 sps:$4 sm:$0xff]   ;;  %v764_v13 = vld [vmem:[#allocation5 + $0x14] ss:$8 sps:$4 sm:$0xff]  }
  0x4e   : > { %v766_v14 = vld [vmem:[#allocation5 + $0x10] ss:$8 sps:$4 sm:$0xff]   ;;  %v767_v15 = vld [vmem:[#allocation5 + $0x4] ss:$8 sps:$4 sm:$0xff]   ;;  %v769_v16 = vld [vmem:[#allocation5] ss:$8 sps:$4 sm:$0xff]  }
  0x4f   : > { %v771_v18 = vld [vmem:[%s1052_s29 + $0x20] sm:$0xff]   ;;  %v772_v19 = vld [vmem:[%s1052_s29 + $0x8] sm:$0xff]   ;;  %v774_v21 = vld [vmem:[%s1052_s29 + $0x10] sm:$0xff]   ;;  %v242_v26 = vshrl.u32 %v241_v25, 7  ;;  %s632_s17 = sshll.u32 %s1048_s26, 8  ;;  %s665_s23 = sshll.u32 %s953_s16, 12 }
  0x50   : > { %382 = vmatpush1.bf16.msra.mxu0 %v751_v4  ;;  %675 = vmatpush1.bf16.msra.mxu1 %v751_v4  ;;  %v773_v20 = vld [vmem:[%s1052_s29 + $0x28] sm:$0xff]   ;;  %v775_v22 = vld [vmem:[%s1052_s29 + $0x30] sm:$0xff]   ;;  %v776_v23 = vld [vmem:[%s1052_s29 + $0x18] sm:$0xff]   ;;  %s1088_s22 = scalar_lea.vmem [#allocation7], %s632_s17  ;;  %s1151_s7 = scalar_lea.hbm %s1205_s3, %s665_s23 }
  0x51   : > { %383 = vmatprep.subr.bf16.mxu0 %v752_v5  ;;  %668 = vmatprep.subr.bf16.mxu1 %v752_v5  ;;  %v777_v24 = vld [vmem:[%s1052_s29 + $0x38] sm:$0xff]   ;;  %v243_v27 = vsub.s32 0, %v242_v26  ;;  %v239_v28 = vld [vmem:[%s1204_s2] sm:$0x3]  ;;  %v247_v29 = vsub.s32 1, %v242_v26  ;;  %s539_s25 = sshll.u32 %s1088_s22, 4  ;;  %s1153_s25 = int_to_ptr.vmem [resolvable:$true] %s539_s25 }
  0x52   : > { %s525_s16 = scalar_lea.sflag [#allocation4], %s1048_s26  ;;  %s832_s8 = scalar_lea.vmem %s1153_s25, 4096 }
  0x53   : > { %v1082_v30 = vrot.slane %v239_v28, %v243_v27  ;;  %v1084_v31 = vrot.slane %v239_v28, %v247_v29  ;;  %p833_p3 = scmp.ne.s32.totalorder %s1153_s25, %s832_s8  ;;  %p1221_p11 = scmp.ne.s32.totalorder %s1215_s6, 0 }
  0x54   : > { %384 = vmatpush1.bf16.msra.mxu0 %v754_v6  ;;  %676 = vmatpush1.bf16.msra.mxu1 %v754_v6  ;;  %s909_s9 = smov [#allocation7]  }
  0x55   : > { %385 = vmatprep.subr.bf16.mxu0 %v755_v7  ;;  %669 = vmatprep.subr.bf16.mxu1 %v755_v7  ;;  %p834_p7 = pnand %p833_p3, %p1221_p11  ;;  %s836_s10 = sshll.u32 %s909_s9, 4  ;;  %s837_s10 = int_to_ptr.vmem [resolvable:$false] %s836_s10 }
  0x56   : > { %s838_s11 = scalar_lea.vmem %s837_s10, 8192  ;;  %p839_p10 = scmp.lt.s32.totalorder %s1153_s25, %s837_s10 }
  0x57   : > { %p835_p12 = pneg %p834_p7  ;;  %p840_p2 = scmp.lt.s32.totalorder %s838_s11, %s832_s8 }
  0x58   : > { %386 = vmatpush1.bf16.msra.mxu0 %v757_v8  ;;  %677 = vmatpush1.bf16.msra.mxu1 %v757_v8 }
  0x59   : > { %387 = vmatprep.subr.bf16.mxu0 %v758_v9  ;;  %670 = vmatprep.subr.bf16.mxu1 %v758_v9  ;;  %p841_p13 = por %p840_p2, %p839_p10 }
  0x5b   : > { %p842_p0 = pnand %p841_p13, %p835_p12 }
  0x5c   : > { %388 = vmatpush1.bf16.msra.mxu0 %v760_v10  ;;  %678 = vmatpush1.bf16.msra.mxu1 %v760_v10 }
  0x5d   : > { %389 = vmatprep.subr.bf16.mxu0 %v761_v11  ;;  %671 = vmatprep.subr.bf16.mxu1 %v761_v11 }
  0x60   : > { %390 = vmatpush1.bf16.msra.mxu0 %v763_v12  ;;  %679 = vmatpush1.bf16.msra.mxu1 %v763_v12 }
  0x61   : > { %391 = vmatprep.subr.bf16.mxu0 %v764_v13  ;;  %672 = vmatprep.subr.bf16.mxu1 %v764_v13 }
  0x64   : > { %392 = vmatpush1.bf16.msra.mxu0 %v766_v14  ;;  %680 = vmatpush1.bf16.msra.mxu1 %v766_v14 }
  0x65   : > { %393 = vmatprep.subr.bf16.mxu0 %v767_v15  ;;  %673 = vmatprep.subr.bf16.mxu1 %v767_v15 }
  0x68   : > { %394 = vmatpush1.bf16.msra.mxu0 %v769_v16  ;;  %681 = vmatpush1.bf16.msra.mxu1 %v769_v16 }
  0x6b   : > { %412 = vmatmul.mubr.bf16.vlgmr.msra.gmra.mxu0 %v770_v17  ;;  %452 = vmatmul.mubr.bf16.vlgmr.msra.gmra.mxu1 %v771_v18 }
  0x6c   : > { %421 = vmatprep.mubr.bf16.mxu0 %v908_v0  ;;  %461 = vmatprep.mubr.bf16.mxu1 %v908_v0 }
  0x73   : > { %422 = vmatmul.mubr.bf16.gmra.mxu0 %v772_v19  ;;  %462 = vmatmul.mubr.bf16.gmra.mxu1 %v773_v20 }
  0x74   : > { %431 = vmatprep.mubr.bf16.mxu0 %v908_v0  ;;  %471 = vmatprep.mubr.bf16.mxu1 %v908_v0 }
  0x7b   : > { %432 = vmatmul.mubr.bf16.gmra.mxu0 %v774_v21  ;;  %472 = vmatmul.mubr.bf16.gmra.mxu1 %v775_v22 }
  0x7c   : > { %441 = vmatprep.mubr.bf16.mxu0 %v908_v0  ;;  %481 = vmatprep.mubr.bf16.mxu1 %v908_v0 }
  0x83   : > { %442 = vmatmul.mubr.bf16.gmra.mxu0 %v776_v23  ;;  %482 = vmatmul.mubr.bf16.gmra.mxu1 %v777_v24 }
 0x12b   : > { %v413_v32 = vpop.f32.mrf.mxu0  ;;  %v453_v33 = vpop.f32.mrf.mxu1 }
 0x12c   : > { %v414_v34 = vadd.f32 %v413_v32, %v1082_v30  ;;  %v454_v35 = vadd.f32 %v453_v33, %v1082_v30 }
 0x12d   : > { %v415_v36 = vpop.f32.mrf.mxu0  ;;  %v455_v37 = vpop.f32.mrf.mxu1 }
 0x12e   : > { %492 = vst [vmem:[%s1088_s22] sm:$0xff] %v414_v34  ;;  %508 = vst [vmem:[%s1088_s22 + $0x80] sm:$0xff] %v454_v35  ;;  %v416_v38 = vadd.f32 %v415_v36, %v1084_v31  ;;  %v456_v39 = vadd.f32 %v455_v37, %v1084_v31 }
 0x12f   : > { %v417_v40 = vpop.f32.mrf.mxu0  ;;  %v457_v41 = vpop.f32.mrf.mxu1 }
 0x130   : > { %493 = vst [vmem:[%s1088_s22 + $0x8] sm:$0xff] %v416_v38  ;;  %509 = vst [vmem:[%s1088_s22 + $0x88] sm:$0xff] %v456_v39  ;;  %v418_v42 = vadd.f32 %v417_v40, %v1082_v30  ;;  %v458_v43 = vadd.f32 %v457_v41, %v1082_v30 }
 0x131   : > { %v419_v44 = vpop.f32.mrf.mxu0  ;;  %v459_v45 = vpop.f32.mrf.mxu1 }
 0x132   : > { %494 = vst [vmem:[%s1088_s22 + $0x10] sm:$0xff] %v418_v42  ;;  %510 = vst [vmem:[%s1088_s22 + $0x90] sm:$0xff] %v458_v43  ;;  %v420_v46 = vadd.f32 %v419_v44, %v1084_v31  ;;  %v460_v47 = vadd.f32 %v459_v45, %v1084_v31 }
 0x133   : > { %v423_v48 = vpop.f32.mrf.mxu0  ;;  %v463_v49 = vpop.f32.mrf.mxu1 }
 0x134   : > { %495 = vst [vmem:[%s1088_s22 + $0x18] sm:$0xff] %v420_v46  ;;  %511 = vst [vmem:[%s1088_s22 + $0x98] sm:$0xff] %v460_v47  ;;  %v424_v50 = vadd.f32 %v423_v48, %v1082_v30  ;;  %v464_v51 = vadd.f32 %v463_v49, %v1082_v30 }
 0x135   : > { %v425_v52 = vpop.f32.mrf.mxu0  ;;  %v465_v53 = vpop.f32.mrf.mxu1 }
 0x136   : > { %496 = vst [vmem:[%s1088_s22 + $0x20] sm:$0xff] %v424_v50  ;;  %512 = vst [vmem:[%s1088_s22 + $0xa0] sm:$0xff] %v464_v51  ;;  %v426_v54 = vadd.f32 %v425_v52, %v1084_v31  ;;  %v466_v55 = vadd.f32 %v465_v53, %v1084_v31 }
 0x137   : > { %v427_v56 = vpop.f32.mrf.mxu0  ;;  %v467_v57 = vpop.f32.mrf.mxu1 }
 0x138   : > { %497 = vst [vmem:[%s1088_s22 + $0x28] sm:$0xff] %v426_v54  ;;  %513 = vst [vmem:[%s1088_s22 + $0xa8] sm:$0xff] %v466_v55  ;;  %v428_v58 = vadd.f32 %v427_v56, %v1082_v30  ;;  %v468_v59 = vadd.f32 %v467_v57, %v1082_v30 }
 0x139   : > { %v429_v60 = vpop.f32.mrf.mxu0  ;;  %v469_v61 = vpop.f32.mrf.mxu1 }
 0x13a   : > { %498 = vst [vmem:[%s1088_s22 + $0x30] sm:$0xff] %v428_v58  ;;  %514 = vst [vmem:[%s1088_s22 + $0xb0] sm:$0xff] %v468_v59  ;;  %v430_v62 = vadd.f32 %v429_v60, %v1084_v31  ;;  %v470_v63 = vadd.f32 %v469_v61, %v1084_v31 }
 0x13b   : > { %v433_v0 = vpop.f32.mrf.mxu0  ;;  %v473_v1 = vpop.f32.mrf.mxu1 }
 0x13c   : > { %499 = vst [vmem:[%s1088_s22 + $0x38] sm:$0xff] %v430_v62  ;;  %515 = vst [vmem:[%s1088_s22 + $0xb8] sm:$0xff] %v470_v63  ;;  %v434_v2 = vadd.f32 %v433_v0, %v1082_v30  ;;  %v474_v3 = vadd.f32 %v473_v1, %v1082_v30 }
 0x13d   : > { %v435_v4 = vpop.f32.mrf.mxu0  ;;  %v475_v5 = vpop.f32.mrf.mxu1 }
 0x13e   : > { %500 = vst [vmem:[%s1088_s22 + $0x40] sm:$0xff] %v434_v2  ;;  %516 = vst [vmem:[%s1088_s22 + $0xc0] sm:$0xff] %v474_v3  ;;  %v436_v6 = vadd.f32 %v435_v4, %v1084_v31  ;;  %v476_v7 = vadd.f32 %v475_v5, %v1084_v31 }
 0x13f   : > { %v437_v8 = vpop.f32.mrf.mxu0  ;;  %v477_v9 = vpop.f32.mrf.mxu1 }
 0x140   : > { %501 = vst [vmem:[%s1088_s22 + $0x48] sm:$0xff] %v436_v6  ;;  %517 = vst [vmem:[%s1088_s22 + $0xc8] sm:$0xff] %v476_v7  ;;  %v438_v10 = vadd.f32 %v437_v8, %v1082_v30  ;;  %v478_v11 = vadd.f32 %v477_v9, %v1082_v30 }
 0x141   : > { %v439_v12 = vpop.f32.mrf.mxu0  ;;  %v479_v13 = vpop.f32.mrf.mxu1 }
 0x142   : > { %502 = vst [vmem:[%s1088_s22 + $0x50] sm:$0xff] %v438_v10  ;;  %518 = vst [vmem:[%s1088_s22 + $0xd0] sm:$0xff] %v478_v11  ;;  %v440_v14 = vadd.f32 %v439_v12, %v1084_v31  ;;  %v480_v15 = vadd.f32 %v479_v13, %v1084_v31 }
 0x143   : > { %v443_v16 = vpop.f32.mrf.mxu0  ;;  %v483_v17 = vpop.f32.mrf.mxu1 }
 0x144   : > { %503 = vst [vmem:[%s1088_s22 + $0x58] sm:$0xff] %v440_v14  ;;  %519 = vst [vmem:[%s1088_s22 + $0xd8] sm:$0xff] %v480_v15  ;;  %v444_v18 = vadd.f32 %v443_v16, %v1082_v30  ;;  %v484_v19 = vadd.f32 %v483_v17, %v1082_v30 }
 0x145   : > { %v445_v20 = vpop.f32.mrf.mxu0  ;;  %v485_v21 = vpop.f32.mrf.mxu1 }
 0x146   : > { %504 = vst [vmem:[%s1088_s22 + $0x60] sm:$0xff] %v444_v18  ;;  %520 = vst [vmem:[%s1088_s22 + $0xe0] sm:$0xff] %v484_v19  ;;  %v446_v22 = vadd.f32 %v445_v20, %v1084_v31  ;;  %v486_v23 = vadd.f32 %v485_v21, %v1084_v31 }
 0x147   : > { %v447_v24 = vpop.f32.mrf.mxu0  ;;  %v487_v25 = vpop.f32.mrf.mxu1 }
 0x148   : > { %505 = vst [vmem:[%s1088_s22 + $0x68] sm:$0xff] %v446_v22  ;;  %521 = vst [vmem:[%s1088_s22 + $0xe8] sm:$0xff] %v486_v23  ;;  %v448_v26 = vadd.f32 %v447_v24, %v1082_v30  ;;  %v488_v27 = vadd.f32 %v487_v25, %v1082_v30 }
 0x149   : > { %v449_v28 = vpop.f32.mrf.mxu0  ;;  %v489_v29 = vpop.f32.mrf.mxu1 }
 0x14a   : > { %506 = vst [vmem:[%s1088_s22 + $0x70] sm:$0xff] %v448_v26  ;;  %522 = vst [vmem:[%s1088_s22 + $0xf0] sm:$0xff] %v488_v27  ;;  %v450_v32 = vadd.f32 %v449_v28, %v1084_v31  ;;  %v490_v33 = vadd.f32 %v489_v29, %v1084_v31 }
 0x14c   : > { %507 = vst [vmem:[%s1088_s22 + $0x78] sm:$0xff] %v450_v32  ;;  %523 = vst [vmem:[%s1088_s22 + $0xf8] sm:$0xff] %v490_v33 }
 0x14d   : > { %845 = shalt.err (!%p842_p0)
}
 0x14e   : > { %s846_s21 = scalar_lea.hbm %s1151_s7, 4096  ;;  %s850_s29 = scalar_lea.hbm %s1205_s3, 8192 }
 0x14f   : > { %p847_p5 = scmp.ne.s32.totalorder %s1151_s7, %s846_s21  ;;  %p851_p4 = scmp.lt.s32.totalorder %s1151_s7, %s1205_s3 }
 0x150   : > { %p852_p6 = scmp.lt.s32.totalorder %s850_s29, %s846_s21 }
 0x151   : > { %p848_p9 = pnand %p847_p5, %p1221_p11 }
 0x152   : > { %p853_p8 = por %p852_p6, %p851_p4 }
 0x153   : > { %p849_p1 = pneg %p848_p9 }
 0x155   : > { %p854_p3 = pnand %p853_p8, %p849_p1 }
 0x157   : > { %857 = shalt.err (!%p854_p3)
}
 0x158   : > { %s910_s17 = smov 256   ;;  %s911_s22 = smov 16  }
 0x159   : > { %688 = dma.vmem_to_hbm [thread:$0]  (%p1221_p11), %s1153_s25, 4096, %s1151_s7, %s525_s16, %s910_s17, %s910_s17, %s911_s22  }
 0x15a PF: > { %s554_s23 = sand.u32 1, %s888_s12   ;;  %p1222_p7 = scmp.ne.s32.totalorder %s1211_s19, 0 }
 0x15b   : > { %p1223_p12 = scmp.ge.s32.totalorder %s900_s15, 2  ;;  %s555_s30 = scalar_lea.sflag [#allocation4], %s554_s23 }
 0x15d   : > { %p699_p10 = pnand %p1223_p12, %p1222_p7 }
 0x15f   : > { %p700_p2 = pneg %p699_p10 }
 0x161   : > { %883 = dma.done.wait (%p700_p2), %s555_s30, 4096  }
 0x162   : > { %885 = vsyncadd (%p700_p2), %s555_s30, 4294963200  ;;  %p17_p13 = scmp.ge.s32.totalorder %s986_s24, 4   ;;  %s1224_s12 = smov %s892_s13 }
 0x163   : > { %s1225_s13 = smov %s896_s14  ;;  %s1226_s14 = smov %s1003_s5 }
 0x164   : > { %s1227_s15 = smov %s986_s24  ;;  %19 = sbr.rel (!%p17_p13) target bundleno = 6 (0x6), region = 81 }
 0x169   :  { %560 = vsyncpa [#allocation3], 1 }
 0x16a   :  { %562 = vsyncpa [#allocation3 + $0x1], 1 }
 0x16b   :  { %563 = vsyncpa [#allocation6], 1 }
 0x16c   :  { %564 = vsyncpa [#allocation4], 1 }
 0x16d   :  { %566 = vsyncpa [#allocation4 + $0x1], 1 }

</bundles_post_ra>
